<compile_context>
chip_gen: v5e
topology: v5e:2x2
jax: 0.10.0
libtpu: 0.0.40
codegen_flags: <defaults>
</compile_context>

<pallas_src>
import math

import jax
import jax.numpy as jnp
from jax.experimental import pallas as pl
from jax.experimental.pallas import tpu as pltpu


def _patch_embed_kernel(x_ref, w_ref, b_ref, o_ref):
    # x_ref: (TM, Kp) streamed, w_ref: (Kp, Np) resident, b_ref: (1, Np) resident,
    # o_ref: (TM, Np).  f32 accumulate on the MXU, bias add on the VPU.
    acc = jnp.dot(x_ref[...], w_ref[...], preferred_element_type=jnp.float32)
    o_ref[...] = (acc + b_ref[...].astype(jnp.float32)).astype(o_ref.dtype)


def _round_up(x, m):
    return ((x + m - 1) // m) * m


def _pick_group(seg_len, d_model, itemsize):
    """G rows packed per output row so G*d_model is (ideally) a multiple of 128.

    Capped so the G-fold MXU FLOP inflation of the block-diagonal weight stays negligible
    (v5e has the weakest MXU), and so the packed weight stays small in VMEM.
    """
    g = 128 // math.gcd(128, d_model)          # power of two
    cap = 8 if itemsize <= 2 else 4            # f32 inputs: keep inflation <= 4x
    g = min(g, cap)
    while g > 1 and g * g * seg_len * d_model * itemsize > (4 << 20):
        g //= 2
    return max(g, 1)


def patch_embedding(x, weight, bias, seg_len, *,
                    target_step_bytes=2 << 20, vmem_budget_bytes=12 << 20):
    """x: (batch, ts_len, ts_dim); weight: (d_model, seg_len) [PyTorch layout]; bias: (d_model,)."""
    batch, ts_len, ts_dim = x.shape
    assert ts_len % seg_len == 0, "ts_len must be a multiple of seg_len"
    seg_num = ts_len // seg_len
    d_model = weight.shape[0]
    M = batch * ts_dim * seg_num
    dtype = x.dtype
    itemsize = jnp.dtype(dtype).itemsize

    # rearrange 'b (seg_num seg_len) d -> (b d seg_num) seg_len' — single relayout copy (XLA).
    x_seg = jnp.transpose(
        x.reshape(batch, seg_num, seg_len, ts_dim), (0, 3, 1, 2)
    ).reshape(M, seg_len)

    # ---- lane packing: G consecutive rows per packed row ----------------------------
    G = _pick_group(seg_len, d_model, itemsize)
    Kp = G * seg_len
    Np = G * d_model
    Mp = -(-M // G)                            # packed rows
    M_pad = Mp * G
    if M_pad != M:                             # at most G-1 pad rows; sliced off afterwards
        x_seg = jnp.pad(x_seg, ((0, M_pad - M), (0, 0)))
    x_pack = x_seg.reshape(Mp, Kp)             # pure row-major regrouping

    # Block-diagonal weight (G copies of W^T) and tiled bias.
    w_t = weight.T.astype(dtype)               # (seg_len, d_model)
    if G > 1:
        idx = jnp.arange(G)
        w_pack = (jnp.zeros((G, seg_len, G, d_model), dtype=dtype)
                  .at[idx, :, idx, :].set(w_t)
                  .reshape(Kp, Np))
        b_pack = jnp.tile(bias.astype(dtype), G).reshape(1, Np)
    else:
        w_pack = w_t
        b_pack = bias.astype(dtype).reshape(1, Np)

    # ---- M-tile: ~target_step_bytes of output per step, VMEM-capped, >=2 steps when possible
    tm = max(target_step_bytes // (Np * itemsize), 8)
    tm_vmem = max(vmem_budget_bytes // (2 * (Kp + Np) * itemsize), 8)
    tm = _round_up(min(tm, tm_vmem), 8)
    if tm >= Mp:
        if Mp >= 16:
            # split into >=2 grid steps so ("parallel",) can use both TCs on v7x
            tm = _round_up(-(-Mp // 2), 8)
        else:
            tm = Mp                            # single block == full dim (always legal)
    grid = (pl.cdiv(Mp, tm),)                  # ragged last block handled by Pallas masking

    cost = pl.CostEstimate(
        flops=2 * Mp * Kp * Np,
        transcendentals=0,
        bytes_accessed=itemsize * (Mp * Kp + Kp * Np + Np + Mp * Np),
    )

    out_pack = pl.pallas_call(
        _patch_embed_kernel,
        out_shape=jax.ShapeDtypeStruct((Mp, Np), dtype),
        grid=grid,
        in_specs=[
            pl.BlockSpec((tm, Kp), lambda i: (i, 0)),      # streamed X tiles (double-buffered)
            pl.BlockSpec((Kp, Np), lambda i: (0, 0)),      # resident packed weight
            pl.BlockSpec((1, Np), lambda i: (0, 0)),       # resident packed bias
        ],
        out_specs=pl.BlockSpec((tm, Np), lambda i: (i, 0)),
        compiler_params=pltpu.CompilerParams(
            dimension_semantics=("parallel",),             # shard M across TCs on v7x
        ),
        cost_estimate=cost,
    )(x_pack, w_pack, b_pack)

    # Unpack: (Mp, G*d_model) -> (M_pad, d_model) -> drop pad rows -> final layout.
    out = out_pack.reshape(M_pad, d_model)[:M]
    return out.reshape(batch, ts_dim, seg_num, d_model)


def _reference(x, weight, bias, seg_len):
    batch, ts_len, ts_dim = x.shape
    seg_num = ts_len // seg_len
    d_model = weight.shape[0]
    x_seg = jnp.transpose(
        x.reshape(batch, seg_num, seg_len, ts_dim), (0, 3, 1, 2)
    ).reshape(-1, seg_len)
    return (x_seg @ weight.T + bias).reshape(batch, ts_dim, seg_num, d_model)


if __name__ == "__main__":
    key = jax.random.PRNGKey(0)
    seg_len, d_model = 8, 32
    kx, kw, kb, k2, k3 = jax.random.split(key, 5)
    bound = 1.0 / math.sqrt(seg_len)
    weight = jax.random.uniform(kw, (d_model, seg_len), minval=-bound, maxval=bound,
                                dtype=jnp.float32)
    bias = jax.random.uniform(kb, (d_model,), minval=-bound, maxval=bound,
                              dtype=jnp.float32)

    # 1) small example consistent with the module's forward (single-block grid path)
    x1 = jax.random.normal(kx, (2, 16, 4), dtype=jnp.float32)
    out1 = jax.block_until_ready(patch_embedding(x1, weight, bias, seg_len))
    ref1 = _reference(x1, weight, bias, seg_len)
    assert out1.shape == (2, 4, 2, d_model)
    assert jnp.allclose(out1, ref1, atol=1e-5, rtol=1e-5)

    # 2) multi-step grid (megacore split path): M = 10*32*8 = 2560 -> 2 grid steps
    x2 = jax.random.normal(k2, (10, 64, 32), dtype=jnp.float32)
    out2 = jax.block_until_ready(patch_embedding(x2, weight, bias, seg_len))
    ref2 = _reference(x2, weight, bias, seg_len)
    assert out2.shape == (10, 32, 8, d_model)
    assert jnp.allclose(out2, ref2, atol=1e-5, rtol=1e-5)

    # 3) ragged last grid block (Mp % tm != 0) plus G-level row padding (M % G != 0)
    x3 = jax.random.normal(k3, (2, 72, 5), dtype=jnp.float32)   # M = 2*5*9 = 90
    out3 = jax.block_until_ready(patch_embedding(x3, weight, bias, seg_len))
    ref3 = _reference(x3, weight, bias, seg_len)
    assert out3.shape == (2, 5, 9, d_model)
    assert jnp.allclose(out3, ref3, atol=1e-5, rtol=1e-5)

    print("KERNEL_OK")
</pallas_src>

<mosaic_0001>
module attributes {stable_mosaic.version = 11 : i64} {
  func.func @_patch_embed_kernel(%arg0: i32, %arg1: memref<4x32xf32, #tpu.memory_space<vmem>>, %arg2: memref<32x128xf32, #tpu.memory_space<vmem>>, %arg3: memref<1x128xf32, #tpu.memory_space<vmem>>, %arg4: memref<4x128xf32, #tpu.memory_space<vmem>>) attributes {dimension_semantics = [#tpu.dimension_semantics<parallel>], iteration_bounds = array<i64: 1>, scalar_prefetch = 0 : i64, scratch_operands = 0 : i64, tpu.core_type = #tpu.core_type<tc>, window_params = [{transform_indices = @transform_0, window_bounds = array<i64: 4, 32>}, {pipeline_mode = #tpu.pipeline_mode<synchronous>, transform_indices = @transform_1, window_bounds = array<i64: 32, 128>}, {pipeline_mode = #tpu.pipeline_mode<synchronous>, transform_indices = @transform_2, window_bounds = array<i64: 1, 128>}, {transform_indices = @transform_3, window_bounds = array<i64: 4, 128>}]} {
    %c0 = arith.constant 0 : index
    %c0_0 = arith.constant 0 : index
    %0 = vector.load %arg1[%c0, %c0_0] : memref<4x32xf32, #tpu.memory_space<vmem>>, vector<4x32xf32>
    %c0_1 = arith.constant 0 : index
    %c0_2 = arith.constant 0 : index
    %1 = vector.load %arg2[%c0_1, %c0_2] : memref<32x128xf32, #tpu.memory_space<vmem>>, vector<32x128xf32>
    %cst = arith.constant dense<0.000000e+00> : vector<4x128xf32>
    %2 = tpu.matmul %0, %1, %cst {dimension_numbers = #tpu.dot_dimension_numbers<[1], [0], [0], [1], [0, 0, 1, 1], [], []>} : vector<4x32xf32>, vector<32x128xf32>, vector<4x128xf32> -> vector<4x128xf32>
    %c0_3 = arith.constant 0 : index
    %c0_4 = arith.constant 0 : index
    %3 = vector.load %arg3[%c0_3, %c0_4] : memref<1x128xf32, #tpu.memory_space<vmem>>, vector<1x128xf32>
    %4 = vector.broadcast %3 : vector<1x128xf32> to vector<4x128xf32>
    %5 = arith.addf %2, %4 : vector<4x128xf32>
    %c0_5 = arith.constant 0 : index
    %c0_6 = arith.constant 0 : index
    %6 = vector.load %arg4[%c0_5, %c0_6] : memref<4x128xf32, #tpu.memory_space<vmem>>, vector<4x128xf32>
    tpu.vector_store %arg4[%c0_5, %c0_6], %5 {strides = array<i32>} : memref<4x128xf32, #tpu.memory_space<vmem>>, vector<4x128xf32>,
    return
  }
  func.func @transform_0(%arg0: i32) -> (i32, i32) {
    %c0_i32 = arith.constant 0 : i32
    %c0_i32_0 = arith.constant 0 : i32
    return %arg0, %c0_i32 : i32, i32
  }
  func.func @transform_1(%arg0: i32) -> (i32, i32) {
    %c0_i32 = arith.constant 0 : i32
    %c0_i32_0 = arith.constant 0 : i32
    %c0_i32_1 = arith.constant 0 : i32
    return %c0_i32, %c0_i32_0 : i32, i32
  }
  func.func @transform_2(%arg0: i32) -> (i32, i32) {
    %c0_i32 = arith.constant 0 : i32
    %c0_i32_0 = arith.constant 0 : i32
    %c0_i32_1 = arith.constant 0 : i32
    return %c0_i32, %c0_i32_0 : i32, i32
  }
  func.func @transform_3(%arg0: i32) -> (i32, i32) {
    %c0_i32 = arith.constant 0 : i32
    %c0_i32_0 = arith.constant 0 : i32
    return %arg0, %c0_i32 : i32, i32
  }
}

</mosaic_0001>

<bundles_post_ra>
// kernel: tpu_custom_call.1
= control target key start
LH: loop header
LB: loop body
LE: loop exit
PB: predicated region body
PF: predicated region fallthrough
CT: control target
= control target key end

     0   :  { %8 = vsyncpa [#allocation3], 0  ;;  %s219_s0 = inlined_call_operand.hbm [shape: f32[4,32], index: 0, kind: input, shape index: {}]   ;;  %s220_s1 = inlined_call_operand.hbm [shape: f32[32,128], index: 1, kind: input, shape index: {}]   ;;  %s221_s2 = inlined_call_operand.vmem [shape: f32[1,128], index: 2, kind: input, shape index: {}]   ;;  %s222_s3 = inlined_call_operand.hbm [shape: f32[4,128], index: 3, kind: output, shape index: {}]  }
   0x1   :  { %9 = vsyncpa [#allocation6], 0 }
   0x2   :  { %10 = vsyncpa [#allocation4], 0  ;;  %s16_s14 = sshll.u32 %s219_s0, 4  ;;  %s182_s15 = smov [#allocation2]   ;;  %s17_s14 = int_to_ptr.hbm [resolvable:$true] %s16_s14 }
   0x3   :  { %s18_s16 = sshll.u32 %s182_s15, 4  ;;  %s26_s19 = sshll.u32 %s220_s1, 4  ;;  %s19_s16 = int_to_ptr.vmem [resolvable:$true] %s18_s16  ;;  %s27_s19 = int_to_ptr.hbm [resolvable:$true] %s26_s19 }
   0x4   :  { %21 = dma.hbm_to_vmem [thread:$0]  %s17_s14, 64, %s19_s16, [#allocation3]  }
   0x5   :  { %s183_s20 = smov [#allocation5]   ;;  %s184_s22 = smov 128  }
   0x6   :  { %s28_s21 = sshll.u32 %s183_s20, 4  ;;  %s185_s23 = smov 8   ;;  %s29_s21 = int_to_ptr.vmem [resolvable:$true] %s28_s21 }
   0x7   :  { %34 = dma.hbm_to_vmem [thread:$0]  %s27_s19, 512, %s29_s21, [#allocation6], %s184_s22, %s184_s22, %s185_s23  }
   0x8   :  { %176 = dma.done.wait [#allocation3], 64  }
   0x9   :  { %177 = vsyncadd [#allocation3], 4294967232 }
   0xa   :  { %178 = dma.done.wait [#allocation6], 512  }
   0xb   :  { %179 = vsyncadd [#allocation6], 4294966784  ;;  %v49_v0 = vld [vmem:[#allocation5 + $0x18] sm:$0xff]  ;;  %v48_v1 = vld [vmem:[#allocation5 + $0x10] sm:$0xff]  ;;  %vm54_vm0 = vcmask 261120   ;;  %s186_s24 = smov [#allocation7]  }
   0xc   :  { %70 = vmatpush.msra.mxu0 %v49_v0  ;;  %v47_v2 = vld [vmem:[#allocation5 + $0x8] sm:$0xff]  ;;  %v46_v3 = vld [vmem:[#allocation5] sm:$0xff]  ;;  %v45_v4 = vld [vmem:[#allocation2] sm:$0xf]  ;;  %s84_s25 = sshll.u32 %s186_s24, 4  ;;  %s86_s28 = sshll.u32 %s222_s3, 4  ;;  %s85_s25 = int_to_ptr.vmem [resolvable:$true] %s84_s25  ;;  %s87_s28 = int_to_ptr.hbm [resolvable:$true] %s86_s28 }
   0xd   :  { %v103_v5 = vld [vmem:[%s221_s2] ss:$0 sm:$0xff] }
   0xe   :  { %71 = vmatpush.msra.mxu0 %v48_v1 }
  0x10   :  { %72 = vmatpush.msra.mxu0 %v47_v2 }
  0x12   :  { %73 = vmatpush.msra.mxu0 %v46_v3 }
  0x13   :  { %97 = vmatmul.msk.f32.vlgmr.msra.gmra.mxu0 %vm54_vm0, %v45_v4 }
  0x90   :  { %v75_v6 = vpop.f32.mrf.mxu0 }
  0x91   :  { %v76_v7 = vadd.f32 %v103_v5, %v75_v6 }
  0x93   :  { %78 = vst [vmem:[#allocation7] sm:$0xf] %v76_v7 }
  0x94   :  { %89 = dma.vmem_to_hbm [thread:$0]  %s85_s25, 64, %s87_s28, [#allocation4]  }
  0x95   :  { %180 = dma.done.wait [#allocation4], 64  }
  0x96   :  { %181 = vsyncadd [#allocation4], 4294967232 }
  0x97   :  { %94 = vsyncpa [#allocation3], 1 }
  0x98   :  { %95 = vsyncpa [#allocation6], 1 }
  0x99   :  { %96 = vsyncpa [#allocation4], 1 }

</bundles_post_ra>
